<compile_context>
chip_gen: v7x
topology: tpu7x:2x2x1
jax: 0.10.0
libtpu: 0.0.40
codegen_flags: <defaults>
</compile_context>

<pallas_src>
import functools

import jax
import jax.numpy as jnp
from jax.experimental import pallas as pl
from jax.experimental.pallas import tpu as pltpu


def reward_table_kernel(idx_ref, table_ref, out_ref, *, num_rows, num_cols):
    # idx_ref:   (2, TN)          int32  VMEM tile of (row, col) index pairs
    # table_ref: (R_pad, C_pad)   f32    resident table (single-buffered)
    # out_ref:   (1, TN)          f32    lane-dense output tile
    rows = idx_ref[0, :]                                    # (TN,) int32
    cols = idx_ref[1, :]                                    # (TN,) int32

    # Wrap negative indices like PyTorch / NumPy advanced indexing (one wrap).
    rows = jnp.where(rows < 0, rows + num_rows, rows)
    cols = jnp.where(cols < 0, cols + num_cols, cols)

    tn = rows.shape[0]
    r_pad, c_pad = table_ref.shape

    # Stage 1 (MXU): row one-hot selects the needed table row per index.
    # TN*R compares on the VPU + one (TN,R)@(R,C) contraction on the MXU.
    row_iota = jax.lax.broadcasted_iota(jnp.int32, (tn, r_pad), 1)
    row_oh = (row_iota == rows[:, None]).astype(jnp.float32)        # (TN, R_pad)
    row_vals = jnp.dot(row_oh, table_ref[...],
                       preferred_element_type=jnp.float32)          # (TN, C_pad)

    # Stage 2 (VPU select + XLU lane reduce): pick the column within each row.
    col_iota = jax.lax.broadcasted_iota(jnp.int32, (tn, c_pad), 1)
    picked = jnp.where(col_iota == cols[:, None], row_vals, 0.0)    # (TN, C_pad)
    out_ref[...] = jnp.sum(picked, axis=1)[None, :]                 # (1, TN)


def reward_table_forward(table: jax.Array, indices: jax.Array) -> jax.Array:
    """table: (R, C) f32; indices: (2, N) int -> (N,) f32 gather."""
    r, c = table.shape
    n = indices.shape[1]

    # Cast only if needed (no redundant hot-path converts).
    if table.dtype != jnp.float32:
        table = table.astype(jnp.float32)
    if indices.dtype != jnp.int32:
        indices = indices.astype(jnp.int32)

    # Pad the table to the f32 layout tile (8 sublanes x 128 lanes).  Padded
    # rows/cols are never selected by valid (in-range) indices.
    r_pad = pl.cdiv(r, 8) * 8
    c_pad = pl.cdiv(c, 128) * 128
    if (r_pad, c_pad) != (r, c):
        table = jnp.pad(table, ((0, r_pad - r), (0, c_pad - c)))

    # Lane tile over N: wide tiles amortize the ~0.35 us per-grid-step overhead.
    if n <= 128:
        tn = 128
    else:
        tn = min(2048, pl.next_power_of_2(n))
    n_pad = pl.cdiv(n, tn) * tn
    if n_pad != n:
        # Pad with (0, 0) index pairs (valid; results discarded by the slice).
        indices = jnp.pad(indices, ((0, 0), (0, n_pad - n)))

    # Explicit VMEM budget: resident table (single buffer) + pipelined index
    # and output tiles (double-buffered) + one-hot / matmul intermediates,
    # plus headroom.  Keeps the VMEM-resident cutoff deterministic on v7x.
    table_bytes = r_pad * c_pad * 4
    tile_bytes = 2 * (2 * tn * 4) + 2 * (tn * 4)
    interm_bytes = 4 * tn * (r_pad + c_pad) * 4
    vmem_limit = int(min(table_bytes + tile_bytes + interm_bytes + (16 << 20),
                         96 << 20))

    kernel = functools.partial(reward_table_kernel, num_rows=r, num_cols=c)

    out = pl.pallas_call(
        kernel,
        out_shape=jax.ShapeDtypeStruct((1, n_pad), jnp.float32),
        grid_spec=pltpu.PrefetchScalarGridSpec(
            num_scalar_prefetch=0,
            grid=(n_pad // tn,),
            in_specs=[
                # Index tile: pipelined (default double-buffered) across the grid.
                pl.BlockSpec((2, tn), lambda i: (0, i)),
                # Resident table: constant block index, single-buffered.
                pl.BlockSpec((r_pad, c_pad), lambda i: (0, 0),
                             pipeline_mode=pl.Buffered(1)),
            ],
            out_specs=pl.BlockSpec((1, tn), lambda i: (0, i)),  # lane-dense out
        ),
        compiler_params=pltpu.CompilerParams(
            dimension_semantics=("parallel",),
            vmem_limit_bytes=vmem_limit,
        ),
    )(indices, table)

    return out[0, :n]


if __name__ == "__main__":
    key = jax.random.PRNGKey(0)
    k_table, k_rows, k_cols = jax.random.split(key, 3)

    # Small shapes consistent with the module: table (16, 16), 8 index pairs.
    R, C, N = 16, 16, 8

    # Deterministic parameter init (stands in for torch.randn(shape)).
    table = jax.random.normal(k_table, (R, C), dtype=jnp.float32)

    rows = jax.random.randint(k_rows, (N,), 0, R, dtype=jnp.int32)
    cols = jax.random.randint(k_cols, (N,), 0, C, dtype=jnp.int32)
    # Exercise PyTorch-style negative-index wrapping on a couple of entries.
    rows = rows.at[0].set(-1)
    cols = cols.at[1].set(-C)
    indices = jnp.stack([rows, cols], axis=0)  # (2, N), like the torch `indices`

    out = reward_table_forward(table, indices)
    out = jax.block_until_ready(out)

    # Reference: plain JAX advanced indexing (matches torch table[idx0, idx1]).
    expected = table[rows, cols]
    assert out.shape == (N,) and out.dtype == jnp.float32
    assert jnp.allclose(out, expected, atol=1e-5, rtol=1e-5)

    print("KERNEL_OK")
</pallas_src>

<mosaic_0001>
module attributes {stable_mosaic.version = 11 : i64} {
  func.func @reward_table_kernel(%arg0: i32, %arg1: memref<2x128xi32, #tpu.memory_space<vmem>>, %arg2: memref<16x128xf32, #tpu.memory_space<vmem>>, %arg3: memref<1x128xf32, #tpu.memory_space<vmem>>) attributes {dimension_semantics = [#tpu.dimension_semantics<parallel>], iteration_bounds = array<i64: 1>, scalar_prefetch = 0 : i64, scratch_operands = 0 : i64, tpu.core_type = #tpu.core_type<tc>, window_params = [{transform_indices = @transform_0, window_bounds = array<i64: 2, 128>}, {pipeline_mode = #tpu.pipeline_mode<synchronous>, transform_indices = @transform_1, window_bounds = array<i64: 16, 128>}, {transform_indices = @transform_2, window_bounds = array<i64: 1, 128>}]} {
    %c0 = arith.constant 0 : index
    %c0_0 = arith.constant 0 : index
    %0 = vector.load %arg1[%c0, %c0_0] : memref<2x128xi32, #tpu.memory_space<vmem>>, vector<1x128xi32>
    %1 = vector.shape_cast %0 : vector<1x128xi32> to vector<128xi32>
    %c1 = arith.constant 1 : index
    %c0_1 = arith.constant 0 : index
    %2 = vector.load %arg1[%c1, %c0_1] : memref<2x128xi32, #tpu.memory_space<vmem>>, vector<1x128xi32>
    %3 = vector.shape_cast %2 : vector<1x128xi32> to vector<128xi32>
    %c0_i32 = arith.constant 0 : i32
    %4 = vector.broadcast %c0_i32 : i32 to vector<128xi32>
    %5 = arith.cmpi slt, %1, %4 : vector<128xi32>
    %c16_i32 = arith.constant 16 : i32
    %6 = vector.broadcast %c16_i32 : i32 to vector<128xi32>
    %7 = arith.addi %1, %6 : vector<128xi32>
    %8 = arith.select %5, %7, %1 : vector<128xi1>, vector<128xi32>
    %c0_i32_2 = arith.constant 0 : i32
    %9 = vector.broadcast %c0_i32_2 : i32 to vector<128xi32>
    %10 = arith.cmpi slt, %3, %9 : vector<128xi32>
    %c16_i32_3 = arith.constant 16 : i32
    %11 = vector.broadcast %c16_i32_3 : i32 to vector<128xi32>
    %12 = arith.addi %3, %11 : vector<128xi32>
    %13 = arith.select %10, %12, %3 : vector<128xi1>, vector<128xi32>
    %14 = tpu.iota {dimensions = array<i32: 1>} : vector<128x16xi32>
    %15 = vector.shape_cast %8 : vector<128xi32> to vector<128x1xi32>
    %16 = vector.broadcast %15 : vector<128x1xi32> to vector<128x16xi32>
    %17 = arith.cmpi eq, %14, %16 : vector<128x16xi32>
    %18 = arith.extui %17 : vector<128x16xi1> to vector<128x16xi32>
    %19 = arith.sitofp %18 : vector<128x16xi32> to vector<128x16xf32>
    %c0_4 = arith.constant 0 : index
    %c0_5 = arith.constant 0 : index
    %20 = vector.load %arg2[%c0_4, %c0_5] : memref<16x128xf32, #tpu.memory_space<vmem>>, vector<16x128xf32>
    %cst = arith.constant dense<0.000000e+00> : vector<128x128xf32>
    %21 = tpu.matmul %19, %20, %cst {dimension_numbers = #tpu.dot_dimension_numbers<[1], [0], [0], [1], [0, 0, 1, 1], [], []>} : vector<128x16xf32>, vector<16x128xf32>, vector<128x128xf32> -> vector<128x128xf32>
    %22 = tpu.iota {dimensions = array<i32: 1>} : vector<128x128xi32>
    %23 = vector.shape_cast %13 : vector<128xi32> to vector<128x1xi32>
    %24 = vector.broadcast %23 : vector<128x1xi32> to vector<128x128xi32>
    %25 = arith.cmpi eq, %22, %24 : vector<128x128xi32>
    %cst_6 = arith.constant 0.000000e+00 : f32
    %26 = vector.broadcast %cst_6 : f32 to vector<128x128xf32>
    %27 = arith.select %25, %21, %26 : vector<128x128xi1>, vector<128x128xf32>
    %cst_7 = arith.constant dense<0.000000e+00> : vector<128xf32>
    %28 = vector.multi_reduction <add>, %27, %cst_7 [1] : vector<128x128xf32> to vector<128xf32>
    %29 = vector.shape_cast %28 : vector<128xf32> to vector<1x128xf32>
    %c0_8 = arith.constant 0 : index
    %c0_9 = arith.constant 0 : index
    %30 = vector.load %arg3[%c0_8, %c0_9] : memref<1x128xf32, #tpu.memory_space<vmem>>, vector<1x128xf32>
    tpu.vector_store %arg3[%c0_8, %c0_9], %29 {strides = array<i32>} : memref<1x128xf32, #tpu.memory_space<vmem>>, vector<1x128xf32>,
    return
  }
  func.func @transform_0(%arg0: i32) -> (i32, i32) {
    %c0_i32 = arith.constant 0 : i32
    %c0_i32_0 = arith.constant 0 : i32
    return %c0_i32, %arg0 : i32, i32
  }
  func.func @transform_1(%arg0: i32) -> (i32, i32) {
    %c0_i32 = arith.constant 0 : i32
    %c0_i32_0 = arith.constant 0 : i32
    %c0_i32_1 = arith.constant 0 : i32
    return %c0_i32, %c0_i32_0 : i32, i32
  }
  func.func @transform_2(%arg0: i32) -> (i32, i32) {
    %c0_i32 = arith.constant 0 : i32
    %c0_i32_0 = arith.constant 0 : i32
    return %c0_i32, %arg0 : i32, i32
  }
}

</mosaic_0001>

<bundles_post_ra>
// kernel: tpu_custom_call.1
= control target key start
LH: loop header
LB: loop body
LE: loop exit
PB: predicated region body
PF: predicated region fallthrough
CT: control target
= control target key end

     0   :  { %7 = vsyncpa [#allocation3], 0  ;;  %s957_s0 = inlined_call_operand.hbm [shape: s32[2,128], index: 0, kind: input, shape index: {}]   ;;  %s958_s1 = inlined_call_operand.hbm [shape: f32[16,128], index: 1, kind: input, shape index: {}]   ;;  %s959_s2 = inlined_call_operand.hbm [shape: f32[1,128], index: 2, kind: output, shape index: {}]  }
   0x1   :  { %8 = vsyncpa [#allocation6], 0 }
   0x2   :  { %9 = vsyncpa [#allocation4], 0  ;;  %s795_s9 = smov [#allocation2]   ;;  %s796_s11 = smov [#allocation5]  }
   0x3   :  { %s16_s10 = sshll.u32 %s795_s9, 4  ;;  %s25_s12 = sshll.u32 %s796_s11, 4  ;;  %s17_s10 = int_to_ptr.vmem [resolvable:$true] %s16_s10  ;;  %s816_s12 = int_to_ptr.vmem [resolvable:$true] %s25_s12 }
   0x4   :  { %s723_s15 = scalar_lea.hbm %s957_s0, 32 }
   0x5   :  { %p724_p0 = scmp.ne.s32.totalorder %s957_s0, %s723_s15  ;;  %p727_p1 = scmp.lt.u32.totalorder %s723_s15, %s957_s0 }
   0x7   :  { %p729_p2 = pnand %p727_p1, %p724_p0 }
   0x9   :  { %732 = shalt.err (!%p729_p2)
}
   0xa   :  { %s733_s20 = scalar_lea.vmem %s17_s10, 32  ;;  %p738_p4 = scmp.lt.s32.totalorder %s17_s10, %s17_s10 }
   0xb   :  { %p734_p3 = scmp.ne.s32.totalorder %s17_s10, %s733_s20  ;;  %p739_p5 = scmp.lt.s32.totalorder %s733_s20, %s733_s20 }
   0xd   :  { %p740_p6 = por %p739_p5, %p738_p4 }
   0xf   :  { %p741_p7 = pnand %p740_p6, %p734_p3 }
  0x11   :  { %744 = shalt.err (!%p741_p7)
}
  0x12   :  { %19 = dma.hbm_to_vmem [thread:$0]  %s957_s0, 32, %s17_s10, [#allocation3]  }
  0x13   :  { %s745_s25 = scalar_lea.hbm %s958_s1, 256 }
  0x14   :  { %p746_p8 = scmp.ne.s32.totalorder %s958_s1, %s745_s25  ;;  %p749_p9 = scmp.lt.u32.totalorder %s745_s25, %s958_s1 }
  0x16   :  { %p751_p10 = pnand %p749_p9, %p746_p8 }
  0x18   :  { %754 = shalt.err (!%p751_p10)
}
  0x19   :  { %s755_s30 = scalar_lea.vmem %s816_s12, 256  ;;  %p760_p12 = scmp.lt.s32.totalorder %s816_s12, %s816_s12 }
  0x1a   :  { %p756_p11 = scmp.ne.s32.totalorder %s816_s12, %s755_s30  ;;  %p761_p13 = scmp.lt.s32.totalorder %s755_s30, %s755_s30 }
  0x1c   :  { %p762_p0 = por %p761_p13, %p760_p12 }
  0x1e   :  { %p763_p1 = pnand %p762_p0, %p756_p11 }
  0x20   :  { %766 = shalt.err (!%p763_p1)
}
  0x21   :  { %s797_s0 = smov 128   ;;  %s798_s3 = smov 8  }
  0x22   :  { %31 = dma.hbm_to_vmem [thread:$0]  %s958_s1, 256, %s816_s12, [#allocation6], %s797_s0, %s797_s0, %s798_s3  }
  0x23   :  { %789 = dma.done.wait [#allocation3], 32  }
  0x24   :  { %790 = vsyncadd [#allocation3], 4294967264 }
  0x25   :  { %791 = dma.done.wait [#allocation6], 256  }
  0x26   :  { %792 = vsyncadd [#allocation6], 4294967040  ;;  %v46_v0 = vlaneseq  ;;  %v38_v2 = vld [vmem:[#allocation2] sm:$0x1]  ;;  %v163_v4 = vld [vmem:[#allocation5] sm:$0xff]  ;;  %vm165_vm2 = vcmask 130048  }
  0x27   :  { %vm40_vm0 = vcmp.lt.s32.totalorder %v38_v2, 0  ;;  %v41_v5 = vadd.s32 16, %v38_v2  ;;  %v164_v6 = vld [vmem:[#allocation5 + $0x8] sm:$0xff]  ;;  %v39_v10 = vld [vmem:[#allocation2 + $0x1] sm:$0x1]  ;;  %v799_v17 = vmov 0.0  }
  0x28   :  { %v847_v1 = vshrl.u32 %v46_v0, 7  ;;  %v711_v7 = vpack.c.bf16 %v164_v6, %v163_v4  ;;  %v44_v11 = vadd.s32 16, %v39_v10  ;;  %vm43_vm1 = vcmp.lt.s32.totalorder %v39_v10, 0  ;;  %s800_s1 = smov [#allocation7]  }
  0x29   :  { %v42_v8 = vsel %vm40_vm0, %v41_v5, %v38_v2  ;;  %v850_v14 = vand.u32 127, %v46_v0  ;;  %s623_s6 = sshll.u32 %s800_s1, 4  ;;  %s624_s6 = int_to_ptr.vmem [resolvable:$true] %s623_s6 }
  0x2a   :  { %v50_v3 = vsub.s32 0, %v847_v1  ;;  %712 = vmatprep.subr.bf16.mxu0 %v711_v7  ;;  %715 = vmatprep.subr.bf16.mxu1 %v711_v7  ;;  %v45_v12 = vsel %vm43_vm1, %v44_v11, %v39_v10  ;;  %s767_s7 = scalar_lea.vmem %s624_s6, 16  ;;  %s771_s8 = scalar_lea.vmem %s624_s6, 32 }
  0x2b   :  { %714 = vmatpush3.bf16.msra.mxu0 %v711_v7  ;;  %716 = vmatpush3.bf16.msra.mxu1 %v711_v7  ;;  %p768_p2 = scmp.ne.s32.totalorder %s624_s6, %s767_s7  ;;  %p772_p3 = scmp.lt.s32.totalorder %s624_s6, %s624_s6 }
  0x2c   :  { %v51_v9 = vrot.slane %v42_v8, %v50_v3  ;;  %v362_v13 = vrot.slane %v45_v12, %v50_v3  ;;  %p773_p4 = scmp.lt.s32.totalorder %s771_s8, %s767_s7 }
  0x2e   :  { %61 = vbcast.lane.b32.xlu1 %v51_v9, 272  ;;  %53 = vbcast.lane.b32.xlu0 %v51_v9, 256  ;;  %p774_p5 = por %p773_p4, %p772_p3 }
  0x30   :  { %p775_p6 = pnand %p774_p5, %p768_p2 }
  0x32   :  { %65 = vbcast.lane.b32.xlu1 %v51_v9, 280  ;;  %57 = vbcast.lane.b32.xlu0 %v51_v9, 264 }
  0x36   :  { %85 = vbcast.lane.b32.xlu1 %v51_v9, 320  ;;  %69 = vbcast.lane.b32.xlu0 %v51_v9, 288 }
  0x3a   :  { %89 = vbcast.lane.b32.xlu1 %v51_v9, 328  ;;  %73 = vbcast.lane.b32.xlu0 %v51_v9, 296 }
  0x3e   :  { %93 = vbcast.lane.b32.xlu1 %v51_v9, 336  ;;  %77 = vbcast.lane.b32.xlu0 %v51_v9, 304 }
  0x42   :  { %97 = vbcast.lane.b32.xlu1 %v51_v9, 344  ;;  %81 = vbcast.lane.b32.xlu0 %v51_v9, 312 }
  0x46   :  { %101 = vbcast.lane.b32.xlu0 %v51_v9, 352  ;;  %105 = vbcast.lane.b32.xlu1 %v51_v9, 360 }
  0x4a   :  { %109 = vbcast.lane.b32.xlu0 %v51_v9, 368  ;;  %113 = vbcast.lane.b32.xlu1 %v51_v9, 376 }
  0x4e   :  { %368 = vbcast.lane.b32.xlu1 %v362_v13, 264  ;;  %364 = vbcast.lane.b32.xlu0 %v362_v13, 256 }
  0x52   :  { %376 = vbcast.lane.b32.xlu1 %v362_v13, 280  ;;  %372 = vbcast.lane.b32.xlu0 %v362_v13, 272 }
  0x56   :  { %384 = vbcast.lane.b32.xlu1 %v362_v13, 296  ;;  %380 = vbcast.lane.b32.xlu0 %v362_v13, 288 }
  0x5a   :  { %392 = vbcast.lane.b32.xlu1 %v362_v13, 312  ;;  %388 = vbcast.lane.b32.xlu0 %v362_v13, 304 }
  0x5e   :  { %400 = vbcast.lane.b32.xlu1 %v362_v13, 328  ;;  %396 = vbcast.lane.b32.xlu0 %v362_v13, 320 }
  0x62   :  { %404 = vbcast.lane.b32.xlu0 %v362_v13, 336  ;;  %408 = vbcast.lane.b32.xlu1 %v362_v13, 344 }
  0x66   :  { %416 = vbcast.lane.b32.xlu1 %v362_v13, 360  ;;  %412 = vbcast.lane.b32.xlu0 %v362_v13, 352 }
  0x6a   :  { %424 = vbcast.lane.b32.xlu1 %v362_v13, 376  ;;  %420 = vbcast.lane.b32.xlu0 %v362_v13, 368 }
  0xa0   :  { %v62_v15 = vpop.permute.xlu1 %61  ;;  %v54_v16 = vpop.permute.xlu0 %53 }
  0xa1   :  { %vm115_vm3 = vcmp.eq.s32.totalorder %v850_v14, %v54_v16  ;;  %vm117_vm4 = vcmp.eq.s32.totalorder %v850_v14, %v62_v15 }
  0xa2   :  { %v633_v18 = vsel %vm115_vm3, 1.0, %v799_v17  ;;  %v635_v22 = vsel %vm117_vm4, 1.0, %v799_v17 }
  0xa3   :  { %687 = vmatprep.mubr.msk.f32.mxu0 %vm165_vm2, %v633_v18 }
  0xa4   :  { %v66_v19 = vpop.permute.xlu1 %65  ;;  %v58_v20 = vpop.permute.xlu0 %57 }
  0xa5   :  { %vm116_vm5 = vcmp.eq.s32.totalorder %v850_v14, %v58_v20  ;;  %vm118_vm6 = vcmp.eq.s32.totalorder %v850_v14, %v66_v19 }
  0xa6   :  { %v634_v21 = vsel %vm116_vm5, 1.0, %v799_v17  ;;  %v636_v25 = vsel %vm118_vm6, 1.0, %v799_v17 }
  0xa7   :  { %688 = vmatmul.mubr.msk.f32.vlgmr.msra.gmra.mrb[0].mxu0 %vm165_vm2, %v634_v21 }
  0xa8   :  { %v86_v23 = vpop.permute.xlu1 %85  ;;  %690 = vmatprep.mubr.msk.f32.mxu0 %vm165_vm2, %v635_v22  ;;  %v70_v24 = vpop.permute.xlu0 %69 }
  0xa9   :  { %vm123_vm7 = vcmp.eq.s32.totalorder %v850_v14, %v86_v23  ;;  %vm119_vm8 = vcmp.eq.s32.totalorder %v850_v14, %v70_v24 }
  0xaa   :  { %v637_v26 = vsel %vm119_vm8, 1.0, %v799_v17  ;;  %v641_v27 = vsel %vm123_vm7, 1.0, %v799_v17 }
  0xab   :  { %691 = vmatmul.mubr.msk.f32.gmra.mrb[2].mxu0 %vm165_vm2, %v636_v25  ;;  %699 = vmatprep.mubr.msk.f32.mxu1 %vm165_vm2, %v641_v27 }
  0xac   :  { %v90_v28 = vpop.permute.xlu1 %89  ;;  %v74_v29 = vpop.permute.xlu0 %73  ;;  %693 = vmatprep.mubr.msk.f32.mxu0 %vm165_vm2, %v637_v26 }
  0xad   :  { %vm124_vm9 = vcmp.eq.s32.totalorder %v850_v14, %v90_v28  ;;  %vm120_vm10 = vcmp.eq.s32.totalorder %v850_v14, %v74_v29 }
  0xae   :  { %v642_v30 = vsel %vm124_vm9, 1.0, %v799_v17  ;;  %v638_v31 = vsel %vm120_vm10, 1.0, %v799_v17 }
  0xaf   :  { %694 = vmatmul.mubr.msk.f32.gmra.mrb[4].mxu0 %vm165_vm2, %v638_v31  ;;  %700 = vmatmul.mubr.msk.f32.vlgmr.msra.gmra.mrb[0].mxu1 %vm165_vm2, %v642_v30 }
  0xb0   :  { %v94_v32 = vpop.permute.xlu1 %93  ;;  %v78_v33 = vpop.permute.xlu0 %77 }
  0xb1   :  { %vm125_vm11 = vcmp.eq.s32.totalorder %v850_v14, %v94_v32  ;;  %vm121_vm12 = vcmp.eq.s32.totalorder %v850_v14, %v78_v33 }
  0xb2   :  { %v643_v34 = vsel %vm125_vm11, 1.0, %v799_v17  ;;  %v639_v35 = vsel %vm121_vm12, 1.0, %v799_v17 }
  0xb3   :  { %696 = vmatprep.mubr.msk.f32.mxu0 %vm165_vm2, %v639_v35  ;;  %702 = vmatprep.mubr.msk.f32.mxu1 %vm165_vm2, %v643_v34 }
  0xb4   :  { %v98_v36 = vpop.permute.xlu1 %97  ;;  %v82_v37 = vpop.permute.xlu0 %81 }
  0xb5   :  { %vm126_vm13 = vcmp.eq.s32.totalorder %v850_v14, %v98_v36  ;;  %vm122_vm14 = vcmp.eq.s32.totalorder %v850_v14, %v82_v37 }
  0xb6   :  { %v644_v38 = vsel %vm126_vm13, 1.0, %v799_v17  ;;  %v640_v39 = vsel %vm122_vm14, 1.0, %v799_v17 }
  0xb7   :  { %697 = vmatmul.mubr.msk.f32.gmra.mrb[6].mxu0 %vm165_vm2, %v640_v39  ;;  %703 = vmatmul.mubr.msk.f32.gmra.mrb[2].mxu1 %vm165_vm2, %v644_v38  ;;  %v510_v38 = vadd.s32 4294967288, %v850_v14 }
  0xb8   :  { %v102_v40 = vpop.permute.xlu0 %101  ;;  %v106_v41 = vpop.permute.xlu1 %105 }
  0xb9   :  { %vm127_vm15 = vcmp.eq.s32.totalorder %v850_v14, %v102_v40  ;;  %vm128_vm0 = vcmp.eq.s32.totalorder %v850_v14, %v106_v41  ;;  %v517_v41 = vadd.s32 4294967280, %v850_v14 }
  0xba   :  { %v645_v42 = vsel %vm127_vm15, 1.0, %v799_v17  ;;  %v646_v43 = vsel %vm128_vm0, 1.0, %v799_v17 }
  0xbb   :  { %705 = vmatprep.mubr.msk.f32.mxu1 %vm165_vm2, %v645_v42  ;;  %v508_v42 = vsub.s32 %v850_v14, %v847_v1 }
  0xbc   :  { %706 = vmatmul.mubr.msk.f32.gmra.mrb[4].mxu1 %vm165_vm2, %v646_v43  ;;  %v110_v44 = vpop.permute.xlu0 %109  ;;  %v114_v45 = vpop.permute.xlu1 %113  ;;  %v524_v43 = vadd.s32 4294967272, %v850_v14 }
  0xbd   :  { %vm129_vm1 = vcmp.eq.s32.totalorder %v850_v14, %v110_v44  ;;  %vm130_vm3 = vcmp.eq.s32.totalorder %v850_v14, %v114_v45  ;;  %v531_v44 = vadd.s32 4294967264, %v850_v14  ;;  %v513_v45 = vsub.s32 %v510_v38, %v847_v1 }
  0xbe   :  { %v647_v46 = vsel %vm129_vm1, 1.0, %v799_v17  ;;  %v648_v47 = vsel %vm130_vm3, 1.0, %v799_v17 }
  0xbf   :  { %708 = vmatprep.mubr.msk.f32.mxu1 %vm165_vm2, %v647_v46 }
  0xc0   :  { %709 = vmatmul.mubr.msk.f32.gmra.mrb[6].mxu1 %vm165_vm2, %v648_v47  ;;  %v369_v48 = vpop.permute.xlu1 %368  ;;  %v365_v49 = vpop.permute.xlu0 %364 }
  0xc1   :  { %vm427_vm4 = vcmp.eq.s32.totalorder %v850_v14, %v369_v48  ;;  %vm426_vm6 = vcmp.eq.s32.totalorder %v850_v14, %v365_v49  ;;  %v520_v48 = vsub.s32 %v517_v41, %v847_v1  ;;  %v538_v49 = vadd.s32 4294967256, %v850_v14 }
  0xc4   :  { %v377_v50 = vpop.permute.xlu1 %376  ;;  %v373_v51 = vpop.permute.xlu0 %372 }
  0xc5   :  { %vm429_vm8 = vcmp.eq.s32.totalorder %v850_v14, %v377_v50  ;;  %vm428_vm11 = vcmp.eq.s32.totalorder %v850_v14, %v373_v51  ;;  %v527_v51 = vsub.s32 %v524_v43, %v847_v1 }
  0xc8   :  { %v385_v52 = vpop.permute.xlu1 %384  ;;  %v381_v53 = vpop.permute.xlu0 %380 }
  0xc9   :  { %vm430_vm10 = vcmp.eq.s32.totalorder %v850_v14, %v381_v53  ;;  %vm431_vm14 = vcmp.eq.s32.totalorder %v850_v14, %v385_v52  ;;  %v534_v52 = vsub.s32 %v531_v44, %v847_v1 }
  0xcc   :  { %v884_v54 = vpop.permute.xlu1 %392  ;;  %v389_v55 = vpop.permute.xlu0 %388 }
  0xcd   :  { %vm432_vm12 = vcmp.eq.s32.totalorder %v850_v14, %v389_v55  ;;  %vm433_vm0 = vcmp.eq.s32.totalorder %v850_v14, %v884_v54  ;;  %v545_v55 = vadd.s32 4294967248, %v850_v14 }
  0xd0   :  { %v401_v59 = vpop.permute.xlu1 %400  ;;  %v397_v61 = vpop.permute.xlu0 %396 }
  0xd1   :  { %vm435_vm2 = vcmp.eq.s32.totalorder %v850_v14, %v401_v59  ;;  %vm434_vm5 = vcmp.eq.s32.totalorder %v850_v14, %v397_v61  ;;  %v552_v59 = vadd.s32 4294967240, %v850_v14 }
  0xd4   :  { %v405_v6 = vpop.permute.xlu0 %404  ;;  %v409_v8 = vpop.permute.xlu1 %408 }
  0xd5   :  { %vm436_vm7 = vcmp.eq.s32.totalorder %v850_v14, %v405_v6  ;;  %vm437_vm9 = vcmp.eq.s32.totalorder %v850_v14, %v409_v8  ;;  %v548_v6 = vsub.s32 %v545_v55, %v847_v1 }
  0xd8   :  { %v413_v17 = vpop.permute.xlu0 %412  ;;  %v417_v28 = vpop.permute.xlu1 %416 }
  0xd9   :  { %vm438_vm13 = vcmp.eq.s32.totalorder %v850_v14, %v413_v17  ;;  %vm439_vm1 = vcmp.eq.s32.totalorder %v850_v14, %v417_v28 }
  0xdc   :  { %v421_v24 = vpop.permute.xlu0 %420  ;;  %v425_v31 = vpop.permute.xlu1 %424 }
  0xdd   :  { %vm440_vm15 = vcmp.eq.s32.totalorder %v850_v14, %v421_v24  ;;  %vm441_vm3 = vcmp.eq.s32.totalorder %v850_v14, %v425_v31  ;;  %v608_v24 = vadd.s32 4294967176, %v850_v14 }
  0xdf   :  { %v611_v38 = vsub.s32 %v608_v24, %v847_v1 }
 0x17a   :  { %v689_v56 = vpop.f32.mrb[0].mxu0 }
 0x17b   :  { %v443_v57 = vsel %vm427_vm4, %v689_v56, 0.0  ;;  %v280_v58 = vpop.f32.mrb[1].mxu0  ;;  %vm515_vm4 = vcmask 130112  }
 0x17c   :  { %460 = vadd.xlane.f32.xlu1 %v443_v57  ;;  %v442_v7 = vsel %vm426_vm6, %v280_v58, 0.0  ;;  %v541_v58 = vsub.s32 %v538_v49, %v847_v1  ;;  %vm536_vm6 = vcmask 326912  }
 0x17e   :  { %v692_v60 = vpop.f32.mrb[2].mxu0 }
 0x17f   :  { %v290_v62 = vpop.f32.mrb[3].mxu0  ;;  %v445_v13 = vsel %vm429_vm8, %v692_v60, 0.0  ;;  %v559_v60 = vadd.s32 4294967232, %v850_v14  ;;  %vm550_vm8 = vcmask 458112  }
 0x180   :  { %v444_v21 = vsel %vm428_vm11, %v290_v62, 0.0  ;;  %vm571_vm11 = vcmask 654912  }
 0x182   :  { %v695_v63 = vpop.f32.mrb[4].mxu0  ;;  %v701_v0 = vpop.f32.mrb[0].mxu1 }
 0x183   :  { %v320_v2 = vpop.f32.mrb[1].mxu1  ;;  %v451_v3 = vsel %vm435_vm2, %v701_v0, 0.0  ;;  %v300_v4 = vpop.f32.mrb[5].mxu0  ;;  %v447_v27 = vsel %vm431_vm14, %v695_v63, 0.0  ;;  %vm522_vm2 = vcmask 195712   ;;  %v566_v63 = vadd.s32 4294967224, %v850_v14 }
 0x184   :  { %476 = vadd.xlane.f32.xlu0 %v451_v3  ;;  %v450_v5 = vsel %vm434_vm5, %v320_v2, 0.0  ;;  %v446_v19 = vsel %vm430_vm10, %v300_v4, 0.0  ;;  %vm529_vm5 = vcmask 261312   ;;  %v573_v0 = vadd.s32 4294967216, %v850_v14 }
 0x185   :  { %474 = vadd.xlane.f32.xlu1 %v450_v5  ;;  %v580_v4 = vadd.s32 4294967208, %v850_v14  ;;  %vm564_vm10 = vcmask 589312   ;;  %vm592_vm14 = vcmask 851712  }
 0x188   :  { %458 = vadd.xlane.f32.xlu0 %v442_v7 }
 0x18a   :  { %v698_v9 = vpop.f32.mrb[6].mxu0  ;;  %v704_v10 = vpop.f32.mrb[2].mxu1 }
 0x18b   :  { %v310_v11 = vpop.f32.mrb[7].mxu0  ;;  %v330_v12 = vpop.f32.mrb[3].mxu1  ;;  %v453_v16 = vsel %vm437_vm9, %v704_v10, 0.0  ;;  %v449_v30 = vsel %vm433_vm0, %v698_v9, 0.0  ;;  %v555_v10 = vsub.s32 %v552_v59, %v847_v1  ;;  %vm557_vm9 = vcmask 523712  }
 0x18c   :  { %464 = vadd.xlane.f32.xlu0 %v445_v13  ;;  %v452_v15 = vsel %vm436_vm7, %v330_v12, 0.0  ;;  %v448_v23 = vsel %vm432_vm12, %v310_v11, 0.0  ;;  %vm543_vm7 = vcmask 392512   ;;  %v562_v12 = vsub.s32 %v559_v60, %v847_v1 }
 0x18d   :  { %478 = vadd.xlane.f32.xlu1 %v452_v15  ;;  %v587_v13 = vadd.s32 4294967200, %v850_v14  ;;  %v601_v15 = vadd.s32 4294967184, %v850_v14  ;;  %vm578_vm12 = vcmask 720512   ;;  %vm606_vm0 = vcmask 982912  }
 0x18f   :  { %v707_v18 = vpop.f32.mrb[4].mxu1  ;;  %v604_v28 = vsub.s32 %v601_v15, %v847_v1 }
 0x190   :  { %480 = vadd.xlane.f32.xlu0 %v453_v16  ;;  %v340_v20 = vpop.f32.mrb[5].mxu1  ;;  %v455_v32 = vsel %vm439_vm1, %v707_v18, 0.0  ;;  %v569_v16 = vsub.s32 %v566_v63, %v847_v1  ;;  %v594_v18 = vadd.s32 4294967192, %v850_v14  ;;  %vm613_vm1 = vcmask 1048512  }
 0x191   :  { %466 = vadd.xlane.f32.xlu1 %v446_v19  ;;  %v454_v26 = vsel %vm438_vm13, %v340_v20, 0.0  ;;  %v576_v19 = vsub.s32 %v573_v0, %v847_v1  ;;  %v583_v20 = vsub.s32 %v580_v4, %v847_v1  ;;  %vm585_vm13 = vcmask 786112  }
 0x192   :  { %v597_v31 = vsub.s32 %v594_v18, %v847_v1 }
 0x193   :  { %v710_v22 = vpop.f32.mrb[6].mxu1 }
 0x194   :  { %462 = vadd.xlane.f32.xlu0 %v444_v21  ;;  %v350_v25 = vpop.f32.mrb[7].mxu1  ;;  %v457_v33 = vsel %vm441_vm3, %v710_v22, 0.0 }
 0x195   :  { %470 = vadd.xlane.f32.xlu1 %v448_v23  ;;  %v456_v29 = vsel %vm440_vm15, %v350_v25, 0.0  ;;  %vm599_vm15 = vcmask 917312  }
 0x198   :  { %468 = vadd.xlane.f32.xlu0 %v447_v27  ;;  %v590_v27 = vsub.s32 %v587_v13, %v847_v1 }
 0x199   :  { %482 = vadd.xlane.f32.xlu1 %v454_v26 }
 0x19c   :  { %472 = vadd.xlane.f32.xlu0 %v449_v30 }
 0x19d   :  { %486 = vadd.xlane.f32.xlu1 %v456_v29 }
 0x1a0   :  { %484 = vadd.xlane.f32.xlu0 %v455_v32 }
 0x1a4   :  { %488 = vadd.xlane.f32.xlu0 %v457_v33 }
 0x209   :  { %v461_v35 = vpop.xlane.xlu1 %460 }
 0x20a   :  { %v514_v53 = vrot.slane %v461_v35, %v513_v45 }
 0x211   :  { %v903_v34 = vpop.xlane.xlu0 %476 }
 0x212   :  { %v475_v37 = vpop.xlane.xlu1 %474  ;;  %v570_v29 = vrot.slane %v903_v34, %v569_v16 }
 0x213   :  { %v563_v25 = vrot.slane %v475_v37, %v562_v12 }
 0x215   :  { %v459_v36 = vpop.xlane.xlu0 %458 }
 0x216   :  { %v509_v50 = vrot.slane %v459_v36, %v508_v42 }
 0x218   :  { %v516_v61 = vsel %vm515_vm4, %v514_v53, %v509_v50 }
 0x219   :  { %v465_v39 = vpop.xlane.xlu0 %464 }
 0x21a   :  { %v906_v40 = vpop.xlane.xlu1 %478  ;;  %v528_v62 = vrot.slane %v465_v39, %v527_v51 }
 0x21b   :  { %v577_v33 = vrot.slane %v906_v40, %v576_v19 }
 0x21d   :  { %v914_v46 = vpop.xlane.xlu0 %480 }
 0x21e   :  { %v467_v47 = vpop.xlane.xlu1 %466  ;;  %v584_v14 = vrot.slane %v914_v46, %v583_v20 }
 0x21f   :  { %v535_v2 = vrot.slane %v467_v47, %v534_v52 }
 0x221   :  { %v463_v54 = vpop.xlane.xlu0 %462 }
 0x222   :  { %v521_v56 = vrot.slane %v463_v54, %v520_v48  ;;  %v471_v57 = vpop.xlane.xlu1 %470 }
 0x223   :  { %v549_v21 = vrot.slane %v471_v57, %v548_v6 }
 0x224   :  { %v523_v3 = vsel %vm522_vm2, %v521_v56, %v516_v61 }
 0x225   :  { %v530_v5 = vsel %vm529_vm5, %v528_v62, %v523_v3  ;;  %v469_v7 = vpop.xlane.xlu0 %468 }
 0x226   :  { %v537_v8 = vsel %vm536_vm6, %v535_v2, %v530_v5  ;;  %v542_v9 = vrot.slane %v469_v7, %v541_v58  ;;  %v483_v11 = vpop.xlane.xlu1 %482 }
 0x227   :  { %v591_v41 = vrot.slane %v483_v11, %v590_v27 }
 0x228   :  { %v544_v17 = vsel %vm543_vm7, %v542_v9, %v537_v8 }
 0x229   :  { %v473_v22 = vpop.xlane.xlu0 %472  ;;  %v551_v26 = vsel %vm550_vm8, %v549_v21, %v544_v17 }
 0x22a   :  { %v556_v23 = vrot.slane %v473_v22, %v555_v10  ;;  %v487_v32 = vpop.xlane.xlu1 %486 }
 0x22b   :  { %v605_v34 = vrot.slane %v487_v32, %v604_v28 }
 0x22c   :  { %v558_v30 = vsel %vm557_vm9, %v556_v23, %v551_v26 }
 0x22d   :  { %v565_v35 = vsel %vm564_vm10, %v563_v25, %v558_v30  ;;  %v485_v36 = vpop.xlane.xlu0 %484 }
 0x22e   :  { %v572_v37 = vsel %vm571_vm11, %v570_v29, %v565_v35  ;;  %v598_v43 = vrot.slane %v485_v36, %v597_v31 }
 0x22f   :  { %v579_v39 = vsel %vm578_vm12, %v577_v33, %v572_v37 }
 0x230   :  { %v586_v42 = vsel %vm585_vm13, %v584_v14, %v579_v39 }
 0x231   :  { %v593_v40 = vsel %vm592_vm14, %v591_v41, %v586_v42  ;;  %v489_v44 = vpop.xlane.xlu0 %488 }
 0x232   :  { %v600_v45 = vsel %vm599_vm15, %v598_v43, %v593_v40  ;;  %v612_v47 = vrot.slane %v489_v44, %v611_v38 }
 0x233   :  { %v607_v46 = vsel %vm606_vm0, %v605_v34, %v600_v45 }
 0x234   :  { %v614_v48 = vsel %vm613_vm1, %v612_v47, %v607_v46 }
 0x235   :  { %616 = vst [vmem:[#allocation7] sm:$0x1] %v614_v48 }
 0x236   :  { %778 = shalt.err (!%p775_p6)
}
 0x237   :  { %s779_s11 = scalar_lea.hbm %s959_s2, 16 }
 0x238   :  { %p780_p7 = scmp.ne.s32.totalorder %s959_s2, %s779_s11  ;;  %p783_p8 = scmp.lt.u32.totalorder %s779_s11, %s959_s2 }
 0x23a   :  { %p785_p9 = pnand %p783_p8, %p780_p7 }
 0x23c   :  { %788 = shalt.err (!%p785_p9)
}
 0x23d   :  { %626 = dma.vmem_to_hbm [thread:$0]  %s624_s6, 16, %s959_s2, [#allocation4]  }
 0x23e   :  { %793 = dma.done.wait [#allocation4], 16  }
 0x23f   :  { %794 = vsyncadd [#allocation4], 4294967280 }
 0x240   :  { %630 = vsyncpa [#allocation3], 1 }
 0x241   :  { %631 = vsyncpa [#allocation6], 1 }
 0x242   :  { %632 = vsyncpa [#allocation4], 1 }

</bundles_post_ra>
